<compile_context>
chip_gen: v7x
topology: tpu7x:2x2x1
jax: 0.10.0
libtpu: 0.0.40
codegen_flags: <defaults>
</compile_context>

<pallas_src>
import math

import jax
import jax.numpy as jnp
from jax.experimental import pallas as pl
from jax.experimental.pallas import tpu as pltpu

CLAMP_VAL = 20.0
_MIB = 1024 * 1024


# ----------------------------------------------------------------------------
# Tile / VMEM sizing helpers
# ----------------------------------------------------------------------------
def _round_up(x, m):
    return ((x + m - 1) // m) * m


def _vmem_budget():
    """(working-set budget, raised scoped-VMEM limit) in bytes, v7x-safe."""
    try:
        phys = int(pltpu.get_tpu_info().vmem_capacity_bytes)
    except Exception:
        phys = 64 * _MIB                      # conservative: v7x per-TC VMEM
    budget = min(int(phys * 0.6), 40 * _MIB)  # keep double-buffered WS < 40 MiB
    limit = min(int(phys * 0.75), 56 * _MIB)  # raised vmem_limit_bytes
    return budget, limit


def _pick_batch_tile(batch_size, bytes_per_row, budget):
    """Largest power-of-two tile (>=8 rows) whose working set fits the budget,
    never larger than the (8-row padded) batch itself."""
    tb = 2048
    while tb > 8 and tb * bytes_per_row > budget:
        tb //= 2
    tb = min(tb, _round_up(batch_size, 8))
    return max(8, _round_up(tb, 8))


# ----------------------------------------------------------------------------
# Path 1: fused gather — tables resident in VMEM, ids scalar-prefetched to SMEM
# ----------------------------------------------------------------------------
def _forward_fused(ent_h, ent_t, rel, rel_inv, heads, rels, tails, tb, vmem_limit):
    B = heads.shape[0]
    D = ent_h.shape[1]
    b_pad = _round_up(B, tb)
    if b_pad != B:
        pad = b_pad - B
        heads = jnp.pad(heads, (0, pad))   # pad with id 0 (valid row)
        rels = jnp.pad(rels, (0, pad))
        tails = jnp.pad(tails, (0, pad))
    ids = jnp.stack([heads, rels, tails], axis=0)  # (3, b_pad) int32, long axis last

    def kernel(ids_ref, eh_ref, et_ref, r_ref, rinv_ref, o_ref, p1_ref, p2_ref):
        base = pl.program_id(0) * tb

        # Gather the rows for this batch tile directly from the VMEM-resident
        # tables into two product scratch buffers (no HBM intermediates).
        @pl.loop(0, tb)
        def _(j):
            col = base + j
            h = ids_ref[0, col]
            rl = ids_ref[1, col]
            t = ids_ref[2, col]
            hh = eh_ref[pl.ds(h, 1), :]      # (1, D)
            ht = eh_ref[pl.ds(t, 1), :]
            th = et_ref[pl.ds(h, 1), :]
            tt = et_ref[pl.ds(t, 1), :]
            rr = r_ref[pl.ds(rl, 1), :]
            ri = rinv_ref[pl.ds(rl, 1), :]
            p1_ref[pl.ds(j, 1), :] = hh * rr * tt
            p2_ref[pl.ds(j, 1), :] = ht * ri * th

        s1 = jnp.sum(p1_ref[...], axis=-1, keepdims=True)   # (tb, 1)
        s2 = jnp.sum(p2_ref[...], axis=-1, keepdims=True)   # (tb, 1)
        o_ref[...] = jnp.clip((s1 + s2) * 0.5, -CLAMP_VAL, CLAMP_VAL)

    # Whole-table blocks with a constant index map -> loaded once, stay resident.
    def table_spec(shape):
        return pl.BlockSpec(shape, lambda i, ids: (0, 0))

    out = pl.pallas_call(
        kernel,
        out_shape=jax.ShapeDtypeStruct((b_pad, 1), jnp.float32),
        grid_spec=pltpu.PrefetchScalarGridSpec(
            num_scalar_prefetch=1,
            grid=(b_pad // tb,),
            in_specs=[table_spec(ent_h.shape), table_spec(ent_t.shape),
                      table_spec(rel.shape), table_spec(rel_inv.shape)],
            out_specs=pl.BlockSpec((tb, 1), lambda i, ids: (i, 0)),
            scratch_shapes=[pltpu.VMEM((tb, D), jnp.float32),
                            pltpu.VMEM((tb, D), jnp.float32)],
        ),
        compiler_params=pltpu.CompilerParams(
            dimension_semantics=("parallel",),
            vmem_limit_bytes=vmem_limit,
        ),
    )(ids, ent_h, ent_t, rel, rel_inv)
    return out[:B, 0]


# ----------------------------------------------------------------------------
# Path 2: fallback for tables that do not fit VMEM — stream pre-gathered rows
# ----------------------------------------------------------------------------
def _pregathered_kernel(hh_ref, r_ref, tt_ref, ht_ref, rinv_ref, th_ref, o_ref):
    s1 = jnp.sum(hh_ref[...] * r_ref[...] * tt_ref[...], axis=-1, keepdims=True)
    s2 = jnp.sum(ht_ref[...] * rinv_ref[...] * th_ref[...], axis=-1, keepdims=True)
    o_ref[...] = jnp.clip((s1 + s2) * 0.5, -CLAMP_VAL, CLAMP_VAL)


def _forward_pregathered(ent_h, ent_t, rel, rel_inv, heads, rels, tails, tb, vmem_limit):
    B = heads.shape[0]
    D = ent_h.shape[1]
    b_pad = _round_up(B, tb)
    if b_pad != B:
        pad = b_pad - B
        heads = jnp.pad(heads, (0, pad))
        rels = jnp.pad(rels, (0, pad))
        tails = jnp.pad(tails, (0, pad))

    hh = ent_h[heads]        # (b_pad, D) XLA gathers (tables too big for VMEM)
    ht = ent_h[tails]
    th = ent_t[heads]
    tt = ent_t[tails]
    r = rel[rels]
    rinv = rel_inv[rels]

    in_spec = pl.BlockSpec((tb, D), lambda i: (i, 0))
    out = pl.pallas_call(
        _pregathered_kernel,
        out_shape=jax.ShapeDtypeStruct((b_pad, 1), jnp.float32),
        grid_spec=pltpu.PrefetchScalarGridSpec(
            num_scalar_prefetch=0,
            grid=(b_pad // tb,),
            in_specs=[in_spec] * 6,
            out_specs=pl.BlockSpec((tb, 1), lambda i: (i, 0)),
        ),
        compiler_params=pltpu.CompilerParams(
            dimension_semantics=("parallel",),
            vmem_limit_bytes=vmem_limit,
        ),
    )(hh, r, tt, ht, rinv, th)
    return out[:B, 0]


# ----------------------------------------------------------------------------
# Public forward
# ----------------------------------------------------------------------------
def simple_forward(ent_h, ent_t, rel, rel_inv, batch, *, tb=None, fuse_gather=None):
    """SimplE forward pass. `batch` is an int (B, 3) array of (head, rel, tail) ids."""
    heads = batch[:, 0].astype(jnp.int32)
    rels = batch[:, 1].astype(jnp.int32)
    tails = batch[:, 2].astype(jnp.int32)
    B = heads.shape[0]
    D = ent_h.shape[1]

    budget, vmem_limit = _vmem_budget()
    table_bytes = 4 * D * (ent_h.shape[0] + ent_t.shape[0] + rel.shape[0] + rel_inv.shape[0])
    if fuse_gather is None:
        fuse_gather = table_bytes <= budget // 2

    if fuse_gather:
        # Per-row working set: 2 product scratch rows + double-buffered output.
        bytes_per_row = 2 * D * 4 + 2 * 4
        if tb is None:
            tb = _pick_batch_tile(B, bytes_per_row, max(budget - table_bytes, 8 * bytes_per_row))
        else:
            tb = max(8, _round_up(int(tb), 8))
        return _forward_fused(ent_h, ent_t, rel, rel_inv, heads, rels, tails, tb, vmem_limit)

    # Per-row working set: 6 inputs x 2 pipeline buffers + double-buffered output.
    bytes_per_row = 6 * 2 * D * 4 + 2 * 4
    if tb is None:
        tb = _pick_batch_tile(B, bytes_per_row, budget)
    else:
        tb = max(8, _round_up(int(tb), 8))
    return _forward_pregathered(ent_h, ent_t, rel, rel_inv, heads, rels, tails, tb, vmem_limit)


def init_simple_params(key, num_ent, num_rel, emb_dim):
    """Deterministic uniform(-6/sqrt(dim), 6/sqrt(dim)) init, as in the module."""
    sqrt_size = 6.0 / math.sqrt(emb_dim)
    k1, k2, k3, k4 = jax.random.split(key, 4)
    u = lambda k, n: jax.random.uniform(
        k, (n, emb_dim), jnp.float32, minval=-sqrt_size, maxval=sqrt_size)
    return u(k1, num_ent), u(k2, num_ent), u(k3, num_rel), u(k4, num_rel)


if __name__ == "__main__":
    num_ent, num_rel, emb_dim = 32, 8, 32

    key = jax.random.PRNGKey(0)
    kparam, kh, kr, kt = jax.random.split(key, 4)
    ent_h, ent_t, rel, rel_inv = init_simple_params(kparam, num_ent, num_rel, emb_dim)

    def ref_scores(batch):
        h, r, t = batch[:, 0], batch[:, 1], batch[:, 2]
        s1 = jnp.sum(ent_h[h] * rel[r] * ent_t[t], axis=1)
        s2 = jnp.sum(ent_h[t] * rel_inv[r] * ent_t[h], axis=1)
        return jnp.clip((s1 + s2) / 2.0, -20.0, 20.0)

    # Case 1: fused-gather path, batch not a multiple of the tile, grid > 1.
    B1 = 10
    heads = jax.random.randint(kh, (B1,), 0, num_ent, dtype=jnp.int32)
    rels = jax.random.randint(kr, (B1,), 0, num_rel, dtype=jnp.int32)
    tails = jax.random.randint(kt, (B1,), 0, num_ent, dtype=jnp.int32)
    batch1 = jnp.stack([heads, rels, tails], axis=1)
    out1 = jax.block_until_ready(
        simple_forward(ent_h, ent_t, rel, rel_inv, batch1, tb=8, fuse_gather=True))
    assert out1.shape == (B1,)
    assert jnp.allclose(out1, ref_scores(batch1), atol=1e-5, rtol=1e-5)

    # Case 2: pre-gathered streaming fallback path, padded multi-step grid.
    kh2, kr2, kt2 = jax.random.split(jax.random.PRNGKey(1), 3)
    B2 = 40
    heads2 = jax.random.randint(kh2, (B2,), 0, num_ent, dtype=jnp.int32)
    rels2 = jax.random.randint(kr2, (B2,), 0, num_rel, dtype=jnp.int32)
    tails2 = jax.random.randint(kt2, (B2,), 0, num_ent, dtype=jnp.int32)
    batch2 = jnp.stack([heads2, rels2, tails2], axis=1)
    out2 = jax.block_until_ready(
        simple_forward(ent_h, ent_t, rel, rel_inv, batch2, tb=16, fuse_gather=False))
    assert out2.shape == (B2,)
    assert jnp.allclose(out2, ref_scores(batch2), atol=1e-5, rtol=1e-5)

    # Case 3: fully automatic configuration (auto tile, auto path selection).
    out3 = jax.block_until_ready(simple_forward(ent_h, ent_t, rel, rel_inv, batch2))
    assert jnp.allclose(out3, ref_scores(batch2), atol=1e-5, rtol=1e-5)

    print("KERNEL_OK")
</pallas_src>

<mosaic_0001>
module attributes {stable_mosaic.version = 11 : i64} {
  func.func @kernel(%arg0: i32, %arg1: memref<3x16xi32, #tpu.memory_space<smem>>, %arg2: memref<32x32xf32, #tpu.memory_space<vmem>>, %arg3: memref<32x32xf32, #tpu.memory_space<vmem>>, %arg4: memref<8x32xf32, #tpu.memory_space<vmem>>, %arg5: memref<8x32xf32, #tpu.memory_space<vmem>>, %arg6: memref<8x1xf32, #tpu.memory_space<vmem>>, %arg7: memref<8x32xf32, #tpu.memory_space<vmem>>, %arg8: memref<8x32xf32, #tpu.memory_space<vmem>>) attributes {dimension_semantics = [#tpu.dimension_semantics<parallel>], iteration_bounds = array<i64: 2>, scalar_prefetch = 1 : i64, scratch_operands = 2 : i64, tpu.core_type = #tpu.core_type<tc>, window_params = [{pipeline_mode = #tpu.pipeline_mode<synchronous>, transform_indices = @transform_0, window_bounds = array<i64: 32, 32>}, {pipeline_mode = #tpu.pipeline_mode<synchronous>, transform_indices = @transform_1, window_bounds = array<i64: 32, 32>}, {pipeline_mode = #tpu.pipeline_mode<synchronous>, transform_indices = @transform_2, window_bounds = array<i64: 8, 32>}, {pipeline_mode = #tpu.pipeline_mode<synchronous>, transform_indices = @transform_3, window_bounds = array<i64: 8, 32>}, {transform_indices = @transform_4, window_bounds = array<i64: 8, 1>}]} {
    %c8_i32 = arith.constant 8 : i32
    %0 = arith.muli %arg0, %c8_i32 : i32
    %c0_i32 = arith.constant 0 : i32
    %c8_i32_0 = arith.constant 8 : i32
    %1 = arith.addi %c0_i32, %c8_i32_0 : i32
    %c1_i32 = arith.constant 1 : i32
    scf.for %arg9 = %c0_i32 to %1 step %c1_i32  : i32 {
      %c1_i32_11 = arith.constant 1 : i32
      %16 = arith.muli %arg9, %c1_i32_11 : i32
      %c0_i32_12 = arith.constant 0 : i32
      %17 = arith.addi %c0_i32_12, %16 : i32
      %18 = arith.addi %0, %17 : i32
      %c0_13 = arith.constant 0 : index
      %19 = arith.index_cast %18 : i32 to index
      %20 = memref.load %arg1[%c0_13, %19] : memref<3x16xi32, #tpu.memory_space<smem>>
      %c1 = arith.constant 1 : index
      %21 = arith.index_cast %18 : i32 to index
      %22 = memref.load %arg1[%c1, %21] : memref<3x16xi32, #tpu.memory_space<smem>>
      %c2 = arith.constant 2 : index
      %23 = arith.index_cast %18 : i32 to index
      %24 = memref.load %arg1[%c2, %23] : memref<3x16xi32, #tpu.memory_space<smem>>
      %25 = arith.index_cast %20 : i32 to index
      %c0_14 = arith.constant 0 : index
      %26 = vector.load %arg2[%25, %c0_14] : memref<32x32xf32, #tpu.memory_space<vmem>>, vector<1x32xf32>
      %27 = arith.index_cast %24 : i32 to index
      %c0_15 = arith.constant 0 : index
      %28 = vector.load %arg2[%27, %c0_15] : memref<32x32xf32, #tpu.memory_space<vmem>>, vector<1x32xf32>
      %29 = arith.index_cast %20 : i32 to index
      %c0_16 = arith.constant 0 : index
      %30 = vector.load %arg3[%29, %c0_16] : memref<32x32xf32, #tpu.memory_space<vmem>>, vector<1x32xf32>
      %31 = arith.index_cast %24 : i32 to index
      %c0_17 = arith.constant 0 : index
      %32 = vector.load %arg3[%31, %c0_17] : memref<32x32xf32, #tpu.memory_space<vmem>>, vector<1x32xf32>
      %33 = arith.index_cast %22 : i32 to index
      %c0_18 = arith.constant 0 : index
      %34 = vector.load %arg4[%33, %c0_18] : memref<8x32xf32, #tpu.memory_space<vmem>>, vector<1x32xf32>
      %35 = arith.index_cast %22 : i32 to index
      %c0_19 = arith.constant 0 : index
      %36 = vector.load %arg5[%35, %c0_19] : memref<8x32xf32, #tpu.memory_space<vmem>>, vector<1x32xf32>
      %37 = arith.mulf %26, %34 : vector<1x32xf32>
      %38 = arith.mulf %37, %32 : vector<1x32xf32>
      %39 = arith.index_cast %17 : i32 to index
      %c0_20 = arith.constant 0 : index
      %40 = vector.load %arg7[%39, %c0_20] : memref<8x32xf32, #tpu.memory_space<vmem>>, vector<1x32xf32>
      tpu.vector_store %arg7[%39, %c0_20], %38 {strides = array<i32>} : memref<8x32xf32, #tpu.memory_space<vmem>>, vector<1x32xf32>,
      %41 = arith.mulf %28, %36 : vector<1x32xf32>
      %42 = arith.mulf %41, %30 : vector<1x32xf32>
      %43 = arith.index_cast %17 : i32 to index
      %c0_21 = arith.constant 0 : index
      %44 = vector.load %arg8[%43, %c0_21] : memref<8x32xf32, #tpu.memory_space<vmem>>, vector<1x32xf32>
      tpu.vector_store %arg8[%43, %c0_21], %42 {strides = array<i32>} : memref<8x32xf32, #tpu.memory_space<vmem>>, vector<1x32xf32>,
    }
    %c8_i32_1 = arith.constant 8 : i32
    %c0 = arith.constant 0 : index
    %c0_2 = arith.constant 0 : index
    %2 = vector.load %arg7[%c0, %c0_2] : memref<8x32xf32, #tpu.memory_space<vmem>>, vector<8x32xf32>
    %cst = arith.constant dense<0.000000e+00> : vector<8xf32>
    %3 = vector.multi_reduction <add>, %2, %cst [1] : vector<8x32xf32> to vector<8xf32>
    %4 = vector.shape_cast %3 : vector<8xf32> to vector<8x1xf32>
    %c0_3 = arith.constant 0 : index
    %c0_4 = arith.constant 0 : index
    %5 = vector.load %arg8[%c0_3, %c0_4] : memref<8x32xf32, #tpu.memory_space<vmem>>, vector<8x32xf32>
    %cst_5 = arith.constant dense<0.000000e+00> : vector<8xf32>
    %6 = vector.multi_reduction <add>, %5, %cst_5 [1] : vector<8x32xf32> to vector<8xf32>
    %7 = vector.shape_cast %6 : vector<8xf32> to vector<8x1xf32>
    %8 = arith.addf %4, %7 : vector<8x1xf32>
    %cst_6 = arith.constant 5.000000e-01 : f32
    %9 = vector.broadcast %cst_6 : f32 to vector<8x1xf32>
    %10 = arith.mulf %8, %9 : vector<8x1xf32>
    %cst_7 = arith.constant -2.000000e+01 : f32
    %cst_8 = arith.constant 2.000000e+01 : f32
    %11 = vector.broadcast %cst_7 : f32 to vector<8x1xf32>
    %12 = arith.maximumf %11, %10 : vector<8x1xf32>
    %13 = vector.broadcast %cst_8 : f32 to vector<8x1xf32>
    %14 = arith.minimumf %13, %12 : vector<8x1xf32>
    %c0_9 = arith.constant 0 : index
    %c0_10 = arith.constant 0 : index
    %15 = vector.load %arg6[%c0_9, %c0_10] : memref<8x1xf32, #tpu.memory_space<vmem>>, vector<8x1xf32>
    tpu.vector_store %arg6[%c0_9, %c0_10], %14 {strides = array<i32>} : memref<8x1xf32, #tpu.memory_space<vmem>>, vector<8x1xf32>,
    return
  }
  func.func @transform_0(%arg0: i32, %arg1: memref<3x16xi32, #tpu.memory_space<smem>>) -> (i32, i32) {
    %c0_i32 = arith.constant 0 : i32
    %c0_i32_0 = arith.constant 0 : i32
    %c0_i32_1 = arith.constant 0 : i32
    return %c0_i32, %c0_i32_0 : i32, i32
  }
  func.func @transform_1(%arg0: i32, %arg1: memref<3x16xi32, #tpu.memory_space<smem>>) -> (i32, i32) {
    %c0_i32 = arith.constant 0 : i32
    %c0_i32_0 = arith.constant 0 : i32
    %c0_i32_1 = arith.constant 0 : i32
    return %c0_i32, %c0_i32_0 : i32, i32
  }
  func.func @transform_2(%arg0: i32, %arg1: memref<3x16xi32, #tpu.memory_space<smem>>) -> (i32, i32) {
    %c0_i32 = arith.constant 0 : i32
    %c0_i32_0 = arith.constant 0 : i32
    %c0_i32_1 = arith.constant 0 : i32
    return %c0_i32, %c0_i32_0 : i32, i32
  }
  func.func @transform_3(%arg0: i32, %arg1: memref<3x16xi32, #tpu.memory_space<smem>>) -> (i32, i32) {
    %c0_i32 = arith.constant 0 : i32
    %c0_i32_0 = arith.constant 0 : i32
    %c0_i32_1 = arith.constant 0 : i32
    return %c0_i32, %c0_i32_0 : i32, i32
  }
  func.func @transform_4(%arg0: i32, %arg1: memref<3x16xi32, #tpu.memory_space<smem>>) -> (i32, i32) {
    %c0_i32 = arith.constant 0 : i32
    %c0_i32_0 = arith.constant 0 : i32
    return %arg0, %c0_i32 : i32, i32
  }
}

</mosaic_0001>

<bundles_post_ra>
// kernel: tpu_custom_call.1
= control target key start
LH: loop header
LB: loop body
LE: loop exit
PB: predicated region body
PF: predicated region fallthrough
CT: control target
= control target key end

     0   :  { %s739_s0 = inlined_call_operand.hbm [shape: s32[3,16], index: 0, kind: input, shape index: {}]   ;;  %s740_s1 = inlined_call_operand.hbm [shape: f32[32,32], index: 1, kind: input, shape index: {}]   ;;  %s741_s2 = inlined_call_operand.hbm [shape: f32[32,32], index: 2, kind: input, shape index: {}]   ;;  %s742_s3 = inlined_call_operand.vmem [shape: f32[8,32], index: 3, kind: input, shape index: {}]   ;;  %s743_s4 = inlined_call_operand.hbm [shape: f32[8,32], index: 4, kind: input, shape index: {}]   ;;  %s744_s5 = inlined_call_operand.vmem [shape: f32[16,1], index: 5, kind: output, shape index: {}]  }
   0x1   :  { %s436_s20 = scalar_lea.hbm %s739_s0, 64 }
   0x2   :  { %p437_p0 = scmp.ne.s32.totalorder %s739_s0, %s436_s20  ;;  %p440_p1 = scmp.lt.u32.totalorder %s436_s20, %s739_s0 }
   0x4   :  { %p442_p2 = pnand %p440_p1, %p437_p0 }
   0x6   :  { %445 = shalt.err (!%p442_p2)  }
   0x7   :  { %s556_s25 = smov [#allocation5]  }
   0x8   :  { %11 = dma.hbm_to_smem %s739_s0, 64, %s556_s25, [#allocation4] }
   0x9   :  { %538 = dma.done.wait [#allocation4], 64 }
   0xa   :  { %539 = vsyncadd [#allocation4], 4294967232 }
   0xb   :  { %13 = sfence }
   0xc   :  { %14 = vsyncpa [#allocation7], 0 }
   0xd   :  { %15 = vsyncpa [#allocation9], 0  ;;  %s604_s28 = smov 0  }
   0xe LB: > { %s610_s29 = sadd.s32 4294967295, %s550_s28   ;;  %p367_p3 = scmp.ge.s32.totalorder %s550_s28, 1  ;;  %s550_s28 = sphi %s604_s28, %s21_s28  }
   0xf   : > { %p136_p4 = scmp.lt.s32.totalorder %s550_s28, 3  ;;  %p745_p5 = scmp.eq.s32.totalorder %s610_s29, 0 }
  0x10   : > { %s557_s30 = smov [#allocation8]   ;;  %s558_s7 = smov [#allocation6]  }
  0x11   : > { %p615_p6 = pnand %p367_p3, %p136_p4  ;;  %s161_s6 = sshll.u32 %s557_s30, 4  ;;  %s162_s6 = int_to_ptr.vmem [resolvable:$true] %s161_s6 }
  0x12   : > { %s148_s8 = sshll.u32 %s558_s7, 4  ;;  %s559_s10 = smov [#allocation10]   ;;  %s627_s8 = int_to_ptr.vmem [resolvable:$true] %s148_s8 }
  0x13   : > { %s747_s0 = scalar_select %p615_p6, 1, 0 }
  0x14   : > { %p398_p7 = pneg %p615_p6  ;;  %s178_s11 = sshll.u32 %s559_s10, 4  ;;  %s629_s11 = int_to_ptr.vmem [resolvable:$true] %s178_s11 }
  0x15   : > { %s446_s14 = scalar_lea.hbm %s741_s2, 512 }
  0x16   : > { %p623_p8 = pnand %p745_p5, %p398_p7  ;;  %p447_p9 = scmp.ne.s32.totalorder %s741_s2, %s446_s14 }
  0x17   : > { %p453_p13 = scmp.lt.u32.totalorder %s446_s14, %s741_s2 }
  0x18   : > { %p639_p10 = pneg %p623_p8 }
  0x1a   : > { %p449_p11 = pnand %p639_p10, %p447_p9 }
  0x1c   : > { %p450_p12 = pneg %p449_p11 }
  0x1e   : > { %p455_p0 = pnand %p453_p13, %p450_p12 }
  0x20   : > { %458 = shalt.err (!%p455_p0)
}
  0x21   : > { %s459_s20 = scalar_lea.vmem %s162_s6, 512  ;;  %p467_p4 = scmp.lt.s32.totalorder %s162_s6, %s162_s6 }
  0x22   : > { %p460_p1 = scmp.ne.s32.totalorder %s162_s6, %s459_s20  ;;  %p468_p7 = scmp.lt.s32.totalorder %s459_s20, %s459_s20 }
  0x24   : > { %p462_p2 = pnand %p460_p1, %p639_p10  ;;  %p469_p5 = por %p468_p7, %p467_p4 }
  0x26   : > { %p463_p3 = pneg %p462_p2 }
  0x28   : > { %p470_p6 = pnand %p469_p5, %p463_p3 }
  0x2a   : > { %473 = shalt.err (!%p470_p6)
}
  0x2b   : > { %s560_s21 = smov 128   ;;  %s561_s22 = smov 8  }
  0x2c   : > { %404 = dma.hbm_to_vmem [thread:$0]  (!%p623_p8), %s741_s2, 512, %s162_s6, [#allocation9], %s560_s21, %s560_s21, %s561_s22  }
  0x2d   : > { %s474_s27 = scalar_lea.hbm %s740_s1, 512 }
  0x2e   : > { %p475_p9 = scmp.ne.s32.totalorder %s740_s1, %s474_s27  ;;  %p481_p11 = scmp.lt.u32.totalorder %s474_s27, %s740_s1 }
  0x30   : > { %p477_p5 = pnand %p475_p9, %p639_p10 }
  0x32   : > { %p478_p6 = pneg %p477_p5 }
  0x34   : > { %p483_p12 = pnand %p481_p11, %p478_p6 }
  0x36   : > { %486 = shalt.err (!%p483_p12)
}
  0x37   : > { %s487_s6 = scalar_lea.vmem %s627_s8, 512  ;;  %p495_p2 = scmp.lt.s32.totalorder %s627_s8, %s627_s8 }
  0x38   : > { %p488_p13 = scmp.ne.s32.totalorder %s627_s8, %s487_s6  ;;  %p496_p3 = scmp.lt.s32.totalorder %s487_s6, %s487_s6 }
  0x3a   : > { %p490_p0 = pnand %p488_p13, %p639_p10  ;;  %p497_p4 = por %p496_p3, %p495_p2 }
  0x3c   : > { %p491_p1 = pneg %p490_p0 }
  0x3e   : > { %p498_p7 = pnand %p497_p4, %p491_p1 }
  0x40   : > { %501 = shalt.err (!%p498_p7)
}
  0x41   : > { %401 = dma.hbm_to_vmem [thread:$0]  (!%p623_p8), %s740_s1, 512, %s627_s8, [#allocation7], %s560_s21, %s560_s21, %s561_s22  }
  0x42   : > { %s502_s18 = scalar_lea.hbm %s743_s4, 128 }
  0x43   : > { %p503_p9 = scmp.ne.s32.totalorder %s743_s4, %s502_s18  ;;  %p509_p11 = scmp.lt.u32.totalorder %s502_s18, %s743_s4 }
  0x45   : > { %p505_p5 = pnand %p503_p9, %p639_p10 }
  0x47   : > { %p506_p6 = pneg %p505_p5 }
  0x49   : > { %p511_p12 = pnand %p509_p11, %p506_p6 }
  0x4b   : > { %514 = shalt.err (!%p511_p12)
}
  0x4c   : > { %s515_s8 = scalar_lea.vmem %s629_s11, 128  ;;  %p523_p2 = scmp.lt.s32.totalorder %s629_s11, %s629_s11 }
  0x4d   : > { %p516_p13 = scmp.ne.s32.totalorder %s629_s11, %s515_s8  ;;  %p524_p3 = scmp.lt.s32.totalorder %s515_s8, %s515_s8 }
  0x4f   : > { %p518_p0 = pnand %p516_p13, %p639_p10  ;;  %p525_p4 = por %p524_p3, %p523_p2 }
  0x51   : > { %p519_p1 = pneg %p518_p0 }
  0x53   : > { %p526_p7 = pnand %p525_p4, %p519_p1 }
  0x55   : > { %529 = shalt.err (!%p526_p7)
}
  0x56   : > { %407 = dma.hbm_to_vmem [thread:$0]  (!%p623_p8), %s743_s4, 128, %s629_s11, [#allocation9]  }
  0x57   : > { %p750_p9 = scmp.ne.s32.totalorder %s747_s0, 0 }
  0x58   : > { %p751_p5 = scmp.eq.s32.totalorder (!%p750_p9), %s610_s29, 0 }
  0x59   : > { %191 = sbr.rel (%p750_p9) target bundleno = 285 (0x11d), region = 36 }
  0x60   : > { %541 = dma.done.wait (%p751_p5), [#allocation7], 512   ;;  %p752_p10 = pmov %p751_p5 }
  0x61   : > { %p753_p6 = pmov %p751_p5 }
  0x62   : > { %543 = vsyncadd (%p752_p10), [#allocation7], 4294966784 }
  0x63   : > { %545 = dma.done.wait (%p753_p6), [#allocation9], 640   ;;  %p754_p11 = pmov %p751_p5 }
  0x64   : > { %p219_p12 = scmp.lt.s32.totalorder %s610_s29, 1  ;;  %s376_s9 = sshll.u32 %s610_s29, 3 }
  0x65   : > { %547 = vsyncadd (%p754_p11), [#allocation9], 4294966656  ;;  %s719_s27 = smov 0  }
  0x66   : > { %s220_s11 = scalar_select %p219_p12, %s610_s29, 1 }
  0x68   : > { %s375_s0 = sshll.u32 %s220_s11, 3 }
  0x69   : > { %s717_s26 = scalar_lea.vmem %s744_s5, %s375_s0 }
  0x6a LB: >> { %s230_s30 = sadd.s32 %s554_s27, %s376_s9  ;;  %vm259_vm0 = vcmask 253952   ;;  %s258_s17 = scalar_lea.vmem [#allocation2], %s554_s27  ;;  %s554_s27 = sphi %s719_s27, %s229_s27  }
  0x6b   : >> { %s231_s7 = sld [smem:[#allocation5 + %s230_s30]]  ;;  %s232_s10 = sshra.s32 %s230_s30, 7 }
  0x6c   : >> { %s382_s12 = sshll.u32 %s232_s10, 7  ;;  %s237_s6 = sand.u32 127, %s230_s30 }
  0x6d   : >> { %s383_s13 = sadd.s32 128, %s382_s12  ;;  %s385_s14 = sadd.s32 256, %s382_s12 }
  0x6e   : >> { %s238_s15 = sadd.s32 %s383_s13, %s237_s6  ;;  %s242_s16 = sadd.s32 %s385_s14, %s237_s6 }
  0x6f   : >> { %s239_s18 = sld [smem:[#allocation5 + %s238_s15]]  ;;  %s263_s25 = scalar_lea.vmem [#allocation3], %s554_s27 }
  0x70   : >> { %s243_s19 = sld [smem:[#allocation5 + %s242_s16]]  ;;  %s229_s27 = sadd.s32 1, %s554_s27  }
  0x71   : >> { %s244_s20 = scalar_lea.vmem [#allocation6], %s231_s7  ;;  %s248_s11 = scalar_lea.vmem [#allocation8], %s231_s7 }
  0x72   : >> { %v245_v0 = vld [vmem:[%s244_s20] sm:$0x1]  ;;  %p226_p8 = scmp.ge.s32.totalorder %s229_s27, 8  }
  0x73   : >> { %v249_v5 = vld [vmem:[%s248_s11] sm:$0x1]  ;;  %vm266_vm1 = vcmask (%p226_p8), 261120   ;;  %vm278_vm2 = vcmask (%p226_p8), 7168  }
  0x75   : >> { %s252_s8 = scalar_lea.vmem %s742_s3, %s239_s18  ;;  %s254_s0 = scalar_lea.vmem [#allocation10], %s239_s18 }
  0x76   : >> { %s250_s21 = scalar_lea.vmem [#allocation8], %s243_s19  ;;  %v253_v2 = vld [vmem:[%s252_s8] sm:$0x1]  ;;  %s246_s22 = scalar_lea.vmem [#allocation6], %s243_s19 }
  0x77   : >> { %v251_v1 = vld [vmem:[%s250_s21] sm:$0x1]  ;;  %v256_v3 = vmul.f32 %v253_v2, %v245_v0 }
  0x78   : >> { %v247_v4 = vld [vmem:[%s246_s22] sm:$0x1]  ;;  %228 = sbr.rel (!%p226_p8) target bundleno = 106 (0x6a), region = 91 }
  0x79   : >> { %v255_v6 = vld [vmem:[%s254_s0] sm:$0x1]  ;;  %v257_v8 = vmul.f32 %v256_v3, %v251_v1 }
  0x7a   : >> { %v261_v7 = vmul.f32 %v255_v6, %v247_v4 }
  0x7b   : >> { %260 = vst.msk [vmem:[%s258_s17] sm:$0x1] %vm259_vm0, %v257_v8 }
  0x7c   : >> { %v262_v9 = vmul.f32 %v261_v7, %v249_v5 }
  0x7e   : >> { %264 = vst.msk [vmem:[%s263_s25] sm:$0x1] %vm259_vm0, %v262_v9 }
  0x82   : > { %v265_v10 = vld [vmem:[#allocation2] sm:$0xff] }
  0x83   : > { %v267_v12 = vsel %vm266_vm1, %v265_v10, 0.0 }
  0x84   : > { %268 = vadd.xlane.f32.xlu0 %v267_v12 }
  0x85   : > { %v270_v11 = vld [vmem:[#allocation3] sm:$0xff] }
  0x86   : > { %v271_v13 = vsel %vm266_vm1, %v270_v11, 0.0 }
  0x88   : > { %272 = vadd.xlane.f32.xlu0 %v271_v13 }
 0x111   : > { %v269_v14 = vpop.xlane.xlu0 %268 }
 0x115   : > { %v273_v15 = vpop.xlane.xlu0 %272 }
 0x116   : > { %v274_v16 = vadd.f32 %v273_v15, %v269_v14 }
 0x118   : > { %v275_v17 = vmul.f32 0.5, %v274_v16 }
 0x11a   : > { %v379_v18 = vclamps-f32 %v275_v17, 20.0 }
 0x11c   : > { %279 = vst.msk [vmem:[%s717_s26] sm:$0xff] %vm278_vm2, %v379_v18 }
 0x11d PF: > { %s21_s28 = sadd.s32 1, %s550_s28  }
 0x11e   : > { %p18_p13 = scmp.ge.s32.totalorder %s21_s28, 4  }
 0x120   :  { %20 = sbr.rel (!%p18_p13) target bundleno = 14 (0xe), region = 102 }
 0x127   :  { %299 = vsyncpa [#allocation7], 1 }
 0x128   :  { %301 = vsyncpa [#allocation7 + $0x1], 1 }
 0x129   :  { %302 = vsyncpa [#allocation9], 1 }

</bundles_post_ra>
